<compile_context>
chip_gen: v7x
topology: tpu7x:2x2x1
jax: 0.10.0
libtpu: 0.0.40
codegen_flags: <defaults>
</compile_context>

<pallas_src>
import functools

import jax
import jax.numpy as jnp
from jax.experimental import pallas as pl
from jax.experimental.pallas import tpu as pltpu


_LANE = 512                          # lane-dense tile width (multiple of 128 -> unmasked vst)
_TILE_BYTES = 4 * 1024 * 1024        # per-input VMEM buffer budget (per pipeline buffer)
_VMEM_LIMIT_BYTES = 32 * 1024 * 1024 # 3 arrays x 2 buffers x 4 MiB = 24 MiB usage + headroom


def _blend_kernel(alpha_ref, a_ref, b_ref, o_ref):
    # alpha_ref: (1,) f32 in SMEM holding alpha = 1 - sigmoid(mix_factor)
    alpha = alpha_ref[0]
    a = a_ref[...].astype(jnp.float32)   # upcast for VPU math (v5e has no bf16 VPU)
    b = b_ref[...].astype(jnp.float32)
    o_ref[...] = (alpha * a + (1.0 - alpha) * b).astype(o_ref.dtype)


def _alpha_blend_impl(mix_factor, x_spatial, x_temporal, tile_bytes):
    """AlphaBlender.forward: (1 - sigmoid(mix)) * x_spatial + sigmoid(mix) * x_temporal."""
    shp = x_spatial.shape
    out_dtype = jnp.result_type(x_spatial.dtype, x_temporal.dtype)

    # Single-element scalar plumbing: sigmoid once in the wrapper (one tiny XLA op), ship the
    # resulting alpha to the kernel via SMEM instead of a padded 1x1 VMEM block.
    alpha = (1.0 - jax.nn.sigmoid(mix_factor.astype(jnp.float32))).reshape(1)

    a = x_spatial.reshape(-1)            # native dtypes, no wrapper-side cast
    b = x_temporal.reshape(-1)
    n = a.size
    rows = n // _LANE                    # full lane-dense rows handled by the kernel
    rem = n - rows * _LANE               # < 512-element tail handled outside the kernel

    pieces = []

    if rows > 0:
        n_main = rows * _LANE
        a2 = a[:n_main].reshape(rows, _LANE)   # metadata-only when rem == 0
        b2 = b[:n_main].reshape(rows, _LANE)

        # Tile rows by byte budget (not a fixed row count) so bf16 gets 2x the rows of f32.
        itemsize = max(a.dtype.itemsize, b.dtype.itemsize, jnp.dtype(out_dtype).itemsize)
        budget_rows = max(16, (tile_bytes // (_LANE * itemsize)) // 16 * 16)
        if rows <= budget_rows:
            tm = rows          # block == full array dims -> (8/16,128) divisibility exempt
        else:
            tm = budget_rows   # multiple of 16 -> legal partial-block tiling for 16-bit dtypes

        out_main = pl.pallas_call(
            _blend_kernel,
            out_shape=jax.ShapeDtypeStruct((rows, _LANE), out_dtype),
            grid=(pl.cdiv(rows, tm),),           # partial last block masked by Pallas (no pad)
            in_specs=[
                pl.BlockSpec(memory_space=pltpu.MemorySpace.SMEM),   # alpha scalar
                pl.BlockSpec((tm, _LANE), lambda i: (i, 0)),          # x_spatial tile
                pl.BlockSpec((tm, _LANE), lambda i: (i, 0)),          # x_temporal tile
            ],
            out_specs=pl.BlockSpec((tm, _LANE), lambda i: (i, 0)),
            compiler_params=pltpu.CompilerParams(
                dimension_semantics=("parallel",),        # megacore sharding on v7x
                vmem_limit_bytes=_VMEM_LIMIT_BYTES,
            ),
        )(alpha, a2, b2)
        pieces.append(out_main.reshape(-1))

    if rem > 0:
        # Sub-lane tail: < 512 elements, blended with plain JAX (negligible traffic).
        a_t = a[rows * _LANE:].astype(jnp.float32)
        b_t = b[rows * _LANE:].astype(jnp.float32)
        al = alpha[0]
        pieces.append((al * a_t + (1.0 - al) * b_t).astype(out_dtype))

    if not pieces:                       # degenerate empty input
        return jnp.zeros(shp, out_dtype)
    out = pieces[0] if len(pieces) == 1 else jnp.concatenate(pieces)
    return out.reshape(shp)


alpha_blend = functools.partial(
    jax.jit(_alpha_blend_impl, static_argnames=("tile_bytes",)), tile_bytes=_TILE_BYTES
)


class AlphaBlender:
    """Functional mirror of the torch module: holds the learnable mix_factor parameter."""

    def __init__(self, alpha: float):
        self.mix_factor = jnp.array([float(alpha)], jnp.float32)

    def __call__(self, x_spatial, x_temporal, tile_bytes=_TILE_BYTES):
        return jax.jit(_alpha_blend_impl, static_argnames=("tile_bytes",))(
            self.mix_factor, x_spatial, x_temporal, tile_bytes=tile_bytes)


if __name__ == "__main__":
    key = jax.random.PRNGKey(0)
    k1, k2, k3, k4, k5, k6 = jax.random.split(key, 6)

    blender = AlphaBlender(alpha=0.5)   # nn.Parameter(torch.Tensor([0.5]))
    a_w = float(1.0 - jax.nn.sigmoid(blender.mix_factor)[0])

    # 1) aligned shape (B, T, H, W, C) as used inside the spatio-temporal VAE blocks:
    #    flat size is a multiple of 512 -> single-block kernel path, zero extra HBM copies.
    shape = (2, 4, 16, 16, 64)
    xs = jax.random.normal(k1, shape, jnp.float32)
    xt = jax.random.normal(k2, shape, jnp.float32)
    out = jax.block_until_ready(blender(xs, xt))
    ref = a_w * xs + (1.0 - a_w) * xt
    assert out.shape == shape and out.dtype == jnp.float32
    assert bool(jnp.all(jnp.isfinite(out)))
    assert bool(jnp.allclose(out, ref, atol=1e-6, rtol=1e-6))

    # 2) multi-step grid with a masked partial last block (small tile budget to force it):
    #    rows = 286, TM = 32 -> 9 grid steps, last block 30 rows, no padding anywhere.
    shape2 = (1, 11, 13, 16, 64)
    y1 = jax.random.normal(k3, shape2, jnp.float32)
    y2 = jax.random.normal(k4, shape2, jnp.float32)
    out2 = jax.block_until_ready(blender(y1, y2, tile_bytes=64 * 1024))
    ref2 = a_w * y1 + (1.0 - a_w) * y2
    assert bool(jnp.allclose(out2, ref2, atol=1e-6, rtol=1e-6))

    # 3) ragged shape smaller than one lane row -> tail-only (non-kernel) path
    shape3 = (3, 5, 17)
    z1 = jax.random.normal(k5, shape3, jnp.float32)
    z2 = jax.random.normal(k6, shape3, jnp.float32)
    out3 = jax.block_until_ready(blender(z1, z2))
    ref3 = a_w * z1 + (1.0 - a_w) * z2
    assert bool(jnp.allclose(out3, ref3, atol=1e-6, rtol=1e-6))

    # 4) main kernel body + sub-lane tail stitched together
    shape4 = (7, 300)                      # 2100 elements = 4 full rows + 52-element tail
    w1 = jax.random.normal(k1, shape4, jnp.float32)
    w2 = jax.random.normal(k2, shape4, jnp.float32)
    out4 = jax.block_until_ready(blender(w1, w2))
    ref4 = a_w * w1 + (1.0 - a_w) * w2
    assert bool(jnp.allclose(out4, ref4, atol=1e-6, rtol=1e-6))

    # 5) bf16 inputs passed through natively (no wrapper cast); kernel upcasts to f32
    xs_b = xs.astype(jnp.bfloat16)
    xt_b = xt.astype(jnp.bfloat16)
    out5 = jax.block_until_ready(blender(xs_b, xt_b))
    ref5 = (a_w * xs_b.astype(jnp.float32)
            + (1.0 - a_w) * xt_b.astype(jnp.float32)).astype(jnp.bfloat16)
    assert out5.dtype == jnp.bfloat16
    assert bool(jnp.allclose(out5.astype(jnp.float32), ref5.astype(jnp.float32),
                             atol=2e-2, rtol=2e-2))

    # 6) mixed dtypes (bf16 spatial + f32 temporal) -> f32 output, no input cast copies
    out6 = jax.block_until_ready(blender(xs_b, xt))
    ref6 = a_w * xs_b.astype(jnp.float32) + (1.0 - a_w) * xt
    assert out6.dtype == jnp.float32
    assert bool(jnp.allclose(out6, ref6, atol=2e-2, rtol=2e-2))

    print("KERNEL_OK")
</pallas_src>

<mosaic_0001>
module attributes {stable_mosaic.version = 11 : i64} {
  func.func @_blend_kernel(%arg0: i32, %arg1: memref<1xf32, #tpu.memory_space<smem>>, %arg2: memref<256x512xf32, #tpu.memory_space<vmem>>, %arg3: memref<256x512xf32, #tpu.memory_space<vmem>>, %arg4: memref<256x512xf32, #tpu.memory_space<vmem>>) attributes {dimension_semantics = [#tpu.dimension_semantics<parallel>], iteration_bounds = array<i64: 1>, scalar_prefetch = 0 : i64, scratch_operands = 0 : i64, tpu.core_type = #tpu.core_type<tc>, window_params = [{transform_indices = @transform_0, window_bounds = array<i64: 1>}, {transform_indices = @transform_1, window_bounds = array<i64: 256, 512>}, {transform_indices = @transform_2, window_bounds = array<i64: 256, 512>}, {transform_indices = @transform_3, window_bounds = array<i64: 256, 512>}]} {
    %c0 = arith.constant 0 : index
    %0 = memref.load %arg1[%c0] : memref<1xf32, #tpu.memory_space<smem>>
    %c0_0 = arith.constant 0 : index
    %c0_1 = arith.constant 0 : index
    %1 = vector.load %arg2[%c0_0, %c0_1] : memref<256x512xf32, #tpu.memory_space<vmem>>, vector<256x512xf32>
    %c0_2 = arith.constant 0 : index
    %c0_3 = arith.constant 0 : index
    %2 = vector.load %arg3[%c0_2, %c0_3] : memref<256x512xf32, #tpu.memory_space<vmem>>, vector<256x512xf32>
    %3 = vector.broadcast %0 : f32 to vector<256x512xf32>
    %4 = arith.mulf %3, %1 : vector<256x512xf32>
    %cst = arith.constant 1.000000e+00 : f32
    %5 = arith.subf %cst, %0 : f32
    %6 = vector.broadcast %5 : f32 to vector<256x512xf32>
    %7 = arith.mulf %6, %2 : vector<256x512xf32>
    %8 = arith.addf %4, %7 : vector<256x512xf32>
    %c0_4 = arith.constant 0 : index
    %c0_5 = arith.constant 0 : index
    %9 = vector.load %arg4[%c0_4, %c0_5] : memref<256x512xf32, #tpu.memory_space<vmem>>, vector<256x512xf32>
    tpu.vector_store %arg4[%c0_4, %c0_5], %8 {strides = array<i32>} : memref<256x512xf32, #tpu.memory_space<vmem>>, vector<256x512xf32>,
    return
  }
  func.func @transform_0(%arg0: i32) -> i32 {
    %c0_i32 = arith.constant 0 : i32
    %c0_i32_0 = arith.constant 0 : i32
    return %c0_i32 : i32
  }
  func.func @transform_1(%arg0: i32) -> (i32, i32) {
    %c0_i32 = arith.constant 0 : i32
    %c0_i32_0 = arith.constant 0 : i32
    return %arg0, %c0_i32 : i32, i32
  }
  func.func @transform_2(%arg0: i32) -> (i32, i32) {
    %c0_i32 = arith.constant 0 : i32
    %c0_i32_0 = arith.constant 0 : i32
    return %arg0, %c0_i32 : i32, i32
  }
  func.func @transform_3(%arg0: i32) -> (i32, i32) {
    %c0_i32 = arith.constant 0 : i32
    %c0_i32_0 = arith.constant 0 : i32
    return %arg0, %c0_i32 : i32, i32
  }
}

</mosaic_0001>

<bundles_post_ra>
// kernel: _alpha_blend_impl.1
= control target key start
LH: loop header
LB: loop body
LE: loop exit
PB: predicated region body
PF: predicated region fallthrough
CT: control target
= control target key end

     0   :  { %s2229_s0 = inlined_call_operand.<no memory space> [shape: f32[1], index: 0, kind: input, shape index: {}]   ;;  %s2230_s1 = inlined_call_operand.vmem [shape: f32[256,512], index: 1, kind: input, shape index: {}]   ;;  %s2231_s2 = inlined_call_operand.vmem [shape: f32[256,512], index: 2, kind: input, shape index: {}]   ;;  %s2232_s3 = inlined_call_operand.vmem [shape: f32[256,512], index: 3, kind: output, shape index: {}]  }
   0x1   :  { %v16_v0 = vld [vmem:[%s2230_s1] sm:$0xff]  ;;  %v820_v2 = vstv %s2229_s0  ;;  %s401_s20 = ssub.f32 1.0, %s2229_s0  ;;  %v17_v3 = vld [vmem:[%s2230_s1 + $0x8] sm:$0xff]  ;;  %v18_v7 = vld [vmem:[%s2230_s1 + $0x10] sm:$0xff] }
   0x2   :  { %v144_v1 = vld [vmem:[%s2231_s2] sm:$0xff]  ;;  %v273_v4 = vmul.f32 %v820_v2, %v16_v0  ;;  %v145_v5 = vld [vmem:[%s2231_s2 + $0x8] sm:$0xff]  ;;  %v274_v6 = vmul.f32 %v820_v2, %v17_v3  ;;  %v146_v8 = vld [vmem:[%s2231_s2 + $0x10] sm:$0xff]  ;;  %v275_v10 = vmul.f32 %v820_v2, %v18_v7 }
   0x3   :  { %v839_v9 = vstv %s401_s20  ;;  %v19_v11 = vld [vmem:[%s2230_s1 + $0x18] sm:$0xff]  ;;  %v20_v13 = vld [vmem:[%s2230_s1 + $0x20] sm:$0xff]  ;;  %v21_v19 = vld [vmem:[%s2230_s1 + $0x28] sm:$0xff] }
   0x4   :  { %v147_v12 = vld [vmem:[%s2231_s2 + $0x18] sm:$0xff]  ;;  %v403_v14 = vmul.f32 %v839_v9, %v144_v1  ;;  %v404_v15 = vmul.f32 %v839_v9, %v145_v5  ;;  %v405_v16 = vmul.f32 %v839_v9, %v146_v8  ;;  %v276_v17 = vmul.f32 %v820_v2, %v19_v11  ;;  %v148_v18 = vld [vmem:[%s2231_s2 + $0x20] sm:$0xff]  ;;  %v149_v20 = vld [vmem:[%s2231_s2 + $0x28] sm:$0xff] }
   0x5   :  { %v406_v21 = vmul.f32 %v839_v9, %v147_v12  ;;  %v277_v22 = vmul.f32 %v820_v2, %v20_v13  ;;  %v407_v23 = vmul.f32 %v839_v9, %v148_v18  ;;  %v278_v24 = vmul.f32 %v820_v2, %v21_v19  ;;  %v22_v25 = vld [vmem:[%s2230_s1 + $0x30] sm:$0xff]  ;;  %v23_v27 = vld [vmem:[%s2230_s1 + $0x38] sm:$0xff]  ;;  %v24_v33 = vld [vmem:[%s2230_s1 + $0x40] sm:$0xff] }
   0x6   :  { %v150_v26 = vld [vmem:[%s2231_s2 + $0x30] sm:$0xff]  ;;  %v531_v28 = vadd.f32 %v403_v14, %v273_v4  ;;  %v532_v29 = vadd.f32 %v404_v15, %v274_v6  ;;  %v533_v30 = vadd.f32 %v405_v16, %v275_v10  ;;  %v408_v31 = vmul.f32 %v839_v9, %v149_v20  ;;  %v151_v32 = vld [vmem:[%s2231_s2 + $0x38] sm:$0xff]  ;;  %v152_v34 = vld [vmem:[%s2231_s2 + $0x40] sm:$0xff] }
   0x7   :  { %v534_v35 = vadd.f32 %v406_v21, %v276_v17  ;;  %v535_v36 = vadd.f32 %v407_v23, %v277_v22  ;;  %v279_v37 = vmul.f32 %v820_v2, %v22_v25  ;;  %v409_v38 = vmul.f32 %v839_v9, %v150_v26  ;;  %v25_v39 = vld [vmem:[%s2230_s1 + $0x48] sm:$0xff]  ;;  %v26_v41 = vld [vmem:[%s2230_s1 + $0x50] sm:$0xff]  ;;  %v27_v47 = vld [vmem:[%s2230_s1 + $0x58] sm:$0xff] }
   0x8   :  { %v153_v40 = vld [vmem:[%s2231_s2 + $0x48] sm:$0xff]  ;;  %659 = vst [vmem:[%s2232_s3] sm:$0xff] %v531_v28  ;;  %660 = vst [vmem:[%s2232_s3 + $0x8] sm:$0xff] %v532_v29  ;;  %v536_v42 = vadd.f32 %v408_v31, %v278_v24  ;;  %v280_v43 = vmul.f32 %v820_v2, %v23_v27  ;;  %v410_v44 = vmul.f32 %v839_v9, %v151_v32  ;;  %v154_v46 = vld [vmem:[%s2231_s2 + $0x50] sm:$0xff] }
   0x9   :  { %661 = vst [vmem:[%s2232_s3 + $0x10] sm:$0xff] %v533_v30  ;;  %v281_v45 = vmul.f32 %v820_v2, %v24_v33  ;;  %v155_v48 = vld [vmem:[%s2231_s2 + $0x58] sm:$0xff]  ;;  %662 = vst [vmem:[%s2232_s3 + $0x18] sm:$0xff] %v534_v35  ;;  %v537_v49 = vadd.f32 %v409_v38, %v279_v37  ;;  %v411_v50 = vmul.f32 %v839_v9, %v152_v34  ;;  %v28_v53 = vld [vmem:[%s2230_s1 + $0x60] sm:$0xff] }
   0xa   :  { %663 = vst [vmem:[%s2232_s3 + $0x20] sm:$0xff] %v535_v36  ;;  %v282_v51 = vmul.f32 %v820_v2, %v25_v39  ;;  %v412_v52 = vmul.f32 %v839_v9, %v153_v40  ;;  %v156_v54 = vld [vmem:[%s2231_s2 + $0x60] sm:$0xff]  ;;  %v29_v55 = vld [vmem:[%s2230_s1 + $0x68] sm:$0xff]  ;;  %664 = vst [vmem:[%s2232_s3 + $0x28] sm:$0xff] %v536_v42  ;;  %v538_v56 = vadd.f32 %v410_v44, %v280_v43 }
   0xb   :  { %v283_v57 = vmul.f32 %v820_v2, %v26_v41  ;;  %v413_v58 = vmul.f32 %v839_v9, %v154_v46  ;;  %v284_v59 = vmul.f32 %v820_v2, %v27_v47  ;;  %v157_v60 = vld [vmem:[%s2231_s2 + $0x68] sm:$0xff]  ;;  %v30_v61 = vld [vmem:[%s2230_s1 + $0x70] sm:$0xff]  ;;  %665 = vst [vmem:[%s2232_s3 + $0x30] sm:$0xff] %v537_v49  ;;  %v539_v63 = vadd.f32 %v411_v50, %v281_v45  ;;  %v31_v4 = vld [vmem:[%s2230_s1 + $0x78] sm:$0xff] }
   0xc   :  { %v158_v62 = vld [vmem:[%s2231_s2 + $0x70] sm:$0xff]  ;;  %v540_v0 = vadd.f32 %v412_v52, %v282_v51  ;;  %v414_v1 = vmul.f32 %v839_v9, %v155_v48  ;;  %v285_v3 = vmul.f32 %v820_v2, %v28_v53  ;;  %v159_v5 = vld [vmem:[%s2231_s2 + $0x78] sm:$0xff]  ;;  %v32_v6 = vld [vmem:[%s2230_s1 + $0x80] sm:$0xff]  ;;  %666 = vst [vmem:[%s2232_s3 + $0x38] sm:$0xff] %v538_v56  ;;  %v415_v8 = vmul.f32 %v839_v9, %v156_v54 }
   0xd   :  { %v541_v7 = vadd.f32 %v413_v58, %v283_v57  ;;  %v286_v10 = vmul.f32 %v820_v2, %v29_v55  ;;  %v416_v11 = vmul.f32 %v839_v9, %v157_v60  ;;  %v160_v12 = vld [vmem:[%s2231_s2 + $0x80] sm:$0xff]  ;;  %v33_v13 = vld [vmem:[%s2230_s1 + $0x88] sm:$0xff]  ;;  %667 = vst [vmem:[%s2232_s3 + $0x40] sm:$0xff] %v539_v63  ;;  %v287_v16 = vmul.f32 %v820_v2, %v30_v61  ;;  %v34_v19 = vld [vmem:[%s2230_s1 + $0x90] sm:$0xff] }
   0xe   :  { %v161_v14 = vld [vmem:[%s2231_s2 + $0x88] sm:$0xff]  ;;  %668 = vst [vmem:[%s2232_s3 + $0x48] sm:$0xff] %v540_v0  ;;  %v542_v15 = vadd.f32 %v414_v1, %v284_v59  ;;  %v417_v17 = vmul.f32 %v839_v9, %v158_v62  ;;  %v288_v18 = vmul.f32 %v820_v2, %v31_v4  ;;  %v162_v20 = vld [vmem:[%s2231_s2 + $0x90] sm:$0xff]  ;;  %v35_v21 = vld [vmem:[%s2230_s1 + $0x98] sm:$0xff]  ;;  %v543_v22 = vadd.f32 %v415_v8, %v285_v3 }
   0xf   :  { %669 = vst [vmem:[%s2232_s3 + $0x50] sm:$0xff] %v541_v7  ;;  %v544_v23 = vadd.f32 %v416_v11, %v286_v10  ;;  %v418_v24 = vmul.f32 %v839_v9, %v159_v5  ;;  %v289_v25 = vmul.f32 %v820_v2, %v32_v6  ;;  %v163_v26 = vld [vmem:[%s2231_s2 + $0x98] sm:$0xff]  ;;  %v36_v27 = vld [vmem:[%s2230_s1 + $0xa0] sm:$0xff]  ;;  %v419_v29 = vmul.f32 %v839_v9, %v160_v12  ;;  %v37_v33 = vld [vmem:[%s2230_s1 + $0xa8] sm:$0xff] }
  0x10   :  { %670 = vst [vmem:[%s2232_s3 + $0x58] sm:$0xff] %v542_v15  ;;  %v545_v28 = vadd.f32 %v417_v17, %v287_v16  ;;  %v290_v30 = vmul.f32 %v820_v2, %v33_v13  ;;  %v420_v31 = vmul.f32 %v839_v9, %v161_v14  ;;  %v164_v32 = vld [vmem:[%s2231_s2 + $0xa0] sm:$0xff]  ;;  %v165_v34 = vld [vmem:[%s2231_s2 + $0xa8] sm:$0xff]  ;;  %671 = vst [vmem:[%s2232_s3 + $0x60] sm:$0xff] %v543_v22 }
  0x11   :  { %672 = vst [vmem:[%s2232_s3 + $0x68] sm:$0xff] %v544_v23  ;;  %v546_v35 = vadd.f32 %v418_v24, %v288_v18  ;;  %v291_v36 = vmul.f32 %v820_v2, %v34_v19  ;;  %v421_v37 = vmul.f32 %v839_v9, %v162_v20  ;;  %v292_v38 = vmul.f32 %v820_v2, %v35_v21  ;;  %v38_v39 = vld [vmem:[%s2230_s1 + $0xb0] sm:$0xff]  ;;  %v39_v41 = vld [vmem:[%s2230_s1 + $0xb8] sm:$0xff]  ;;  %v40_v47 = vld [vmem:[%s2230_s1 + $0xc0] sm:$0xff] }
  0x12   :  { %v166_v40 = vld [vmem:[%s2231_s2 + $0xb0] sm:$0xff]  ;;  %673 = vst [vmem:[%s2232_s3 + $0x70] sm:$0xff] %v545_v28  ;;  %v547_v42 = vadd.f32 %v419_v29, %v289_v25  ;;  %v548_v43 = vadd.f32 %v420_v31, %v290_v30  ;;  %v422_v44 = vmul.f32 %v839_v9, %v163_v26  ;;  %v293_v45 = vmul.f32 %v820_v2, %v36_v27  ;;  %v167_v46 = vld [vmem:[%s2231_s2 + $0xb8] sm:$0xff]  ;;  %v168_v52 = vld [vmem:[%s2231_s2 + $0xc0] sm:$0xff] }
  0x13   :  { %674 = vst [vmem:[%s2232_s3 + $0x78] sm:$0xff] %v546_v35  ;;  %v549_v48 = vadd.f32 %v421_v37, %v291_v36  ;;  %v423_v49 = vmul.f32 %v839_v9, %v164_v32  ;;  %v294_v50 = vmul.f32 %v820_v2, %v37_v33  ;;  %v424_v51 = vmul.f32 %v839_v9, %v165_v34  ;;  %v41_v53 = vld [vmem:[%s2230_s1 + $0xc8] sm:$0xff]  ;;  %v42_v59 = vld [vmem:[%s2230_s1 + $0xd0] sm:$0xff]  ;;  %v43_v61 = vld [vmem:[%s2230_s1 + $0xd8] sm:$0xff] }
  0x14   :  { %v169_v54 = vld [vmem:[%s2231_s2 + $0xc8] sm:$0xff]  ;;  %675 = vst [vmem:[%s2232_s3 + $0x80] sm:$0xff] %v547_v42  ;;  %676 = vst [vmem:[%s2232_s3 + $0x88] sm:$0xff] %v548_v43  ;;  %v550_v55 = vadd.f32 %v422_v44, %v292_v38  ;;  %v295_v56 = vmul.f32 %v820_v2, %v38_v39  ;;  %v425_v57 = vmul.f32 %v839_v9, %v166_v40  ;;  %v170_v60 = vld [vmem:[%s2231_s2 + $0xd0] sm:$0xff] }
  0x15   :  { %v296_v58 = vmul.f32 %v820_v2, %v39_v41  ;;  %677 = vst [vmem:[%s2232_s3 + $0x90] sm:$0xff] %v549_v48  ;;  %v551_v62 = vadd.f32 %v423_v49, %v293_v45  ;;  %v552_v63 = vadd.f32 %v424_v51, %v294_v50  ;;  %v426_v0 = vmul.f32 %v839_v9, %v167_v46  ;;  %v171_v3 = vld [vmem:[%s2231_s2 + $0xd8] sm:$0xff]  ;;  %v44_v4 = vld [vmem:[%s2230_s1 + $0xe0] sm:$0xff]  ;;  %v45_v11 = vld [vmem:[%s2230_s1 + $0xe8] sm:$0xff] }
  0x16   :  { %v297_v1 = vmul.f32 %v820_v2, %v40_v47  ;;  %678 = vst [vmem:[%s2232_s3 + $0x98] sm:$0xff] %v550_v55  ;;  %v553_v5 = vadd.f32 %v425_v57, %v295_v56  ;;  %v427_v6 = vmul.f32 %v839_v9, %v168_v52  ;;  %v298_v7 = vmul.f32 %v820_v2, %v41_v53  ;;  %v172_v10 = vld [vmem:[%s2231_s2 + $0xe0] sm:$0xff]  ;;  %v173_v12 = vld [vmem:[%s2231_s2 + $0xe8] sm:$0xff]  ;;  %v46_v17 = vld [vmem:[%s2230_s1 + $0xf0] sm:$0xff] }
  0x17   :  { %v428_v8 = vmul.f32 %v839_v9, %v169_v54  ;;  %679 = vst [vmem:[%s2232_s3 + $0xa0] sm:$0xff] %v551_v62  ;;  %680 = vst [vmem:[%s2232_s3 + $0xa8] sm:$0xff] %v552_v63  ;;  %v554_v13 = vadd.f32 %v426_v0, %v296_v58  ;;  %v299_v14 = vmul.f32 %v820_v2, %v42_v59  ;;  %v174_v18 = vld [vmem:[%s2231_s2 + $0xf0] sm:$0xff]  ;;  %v47_v19 = vld [vmem:[%s2230_s1 + $0xf8] sm:$0xff] }
  0x18   :  { %v429_v15 = vmul.f32 %v839_v9, %v170_v60  ;;  %v300_v16 = vmul.f32 %v820_v2, %v43_v61  ;;  %681 = vst [vmem:[%s2232_s3 + $0xb0] sm:$0xff] %v553_v5  ;;  %v555_v20 = vadd.f32 %v427_v6, %v297_v1  ;;  %v430_v22 = vmul.f32 %v839_v9, %v171_v3  ;;  %v175_v24 = vld [vmem:[%s2231_s2 + $0xf8] sm:$0xff]  ;;  %v48_v25 = vld [vmem:[%s2230_s1 + $0x100] sm:$0xff]  ;;  %v49_v31 = vld [vmem:[%s2230_s1 + $0x108] sm:$0xff] }
  0x19   :  { %v556_v21 = vadd.f32 %v428_v8, %v298_v7  ;;  %v301_v23 = vmul.f32 %v820_v2, %v44_v4  ;;  %682 = vst [vmem:[%s2232_s3 + $0xb8] sm:$0xff] %v554_v13  ;;  %v431_v27 = vmul.f32 %v839_v9, %v172_v10  ;;  %v302_v28 = vmul.f32 %v820_v2, %v45_v11  ;;  %v176_v30 = vld [vmem:[%s2231_s2 + $0x100] sm:$0xff]  ;;  %v177_v32 = vld [vmem:[%s2231_s2 + $0x108] sm:$0xff]  ;;  %v50_v37 = vld [vmem:[%s2230_s1 + $0x110] sm:$0xff] }
  0x1a   :  { %v557_v26 = vadd.f32 %v429_v15, %v299_v14  ;;  %v432_v29 = vmul.f32 %v839_v9, %v173_v12  ;;  %683 = vst [vmem:[%s2232_s3 + $0xc0] sm:$0xff] %v555_v20  ;;  %v558_v33 = vadd.f32 %v430_v22, %v300_v16  ;;  %v303_v34 = vmul.f32 %v820_v2, %v46_v17  ;;  %v178_v38 = vld [vmem:[%s2231_s2 + $0x110] sm:$0xff]  ;;  %v51_v39 = vld [vmem:[%s2230_s1 + $0x118] sm:$0xff]  ;;  %v52_v45 = vld [vmem:[%s2230_s1 + $0x120] sm:$0xff] }
  0x1b   :  { %684 = vst [vmem:[%s2232_s3 + $0xc8] sm:$0xff] %v556_v21  ;;  %v433_v35 = vmul.f32 %v839_v9, %v174_v18  ;;  %v304_v36 = vmul.f32 %v820_v2, %v47_v19  ;;  %v559_v40 = vadd.f32 %v431_v27, %v301_v23  ;;  %v434_v42 = vmul.f32 %v839_v9, %v175_v24  ;;  %v179_v44 = vld [vmem:[%s2231_s2 + $0x118] sm:$0xff]  ;;  %v180_v50 = vld [vmem:[%s2231_s2 + $0x120] sm:$0xff]  ;;  %v53_v51 = vld [vmem:[%s2230_s1 + $0x128] sm:$0xff] }
  0x1c   :  { %685 = vst [vmem:[%s2232_s3 + $0xd0] sm:$0xff] %v557_v26  ;;  %v560_v41 = vadd.f32 %v432_v29, %v302_v28  ;;  %v305_v43 = vmul.f32 %v820_v2, %v48_v25  ;;  %686 = vst [vmem:[%s2232_s3 + $0xd8] sm:$0xff] %v558_v33  ;;  %v435_v47 = vmul.f32 %v839_v9, %v176_v30  ;;  %v181_v52 = vld [vmem:[%s2231_s2 + $0x128] sm:$0xff]  ;;  %v54_v57 = vld [vmem:[%s2230_s1 + $0x130] sm:$0xff] }
  0x1d   :  { %v561_v46 = vadd.f32 %v433_v35, %v303_v34  ;;  %v306_v48 = vmul.f32 %v820_v2, %v49_v31  ;;  %v436_v49 = vmul.f32 %v839_v9, %v177_v32  ;;  %687 = vst [vmem:[%s2232_s3 + $0xe0] sm:$0xff] %v559_v40  ;;  %v562_v53 = vadd.f32 %v434_v42, %v304_v36  ;;  %v182_v58 = vld [vmem:[%s2231_s2 + $0x130] sm:$0xff]  ;;  %v55_v59 = vld [vmem:[%s2230_s1 + $0x138] sm:$0xff]  ;;  %v56_v1 = vld [vmem:[%s2230_s1 + $0x140] sm:$0xff] }
  0x1e   :  { %688 = vst [vmem:[%s2232_s3 + $0xe8] sm:$0xff] %v560_v41  ;;  %v307_v54 = vmul.f32 %v820_v2, %v50_v37  ;;  %v437_v55 = vmul.f32 %v839_v9, %v178_v38  ;;  %v308_v56 = vmul.f32 %v820_v2, %v51_v39  ;;  %v563_v60 = vadd.f32 %v435_v47, %v305_v43  ;;  %v183_v0 = vld [vmem:[%s2231_s2 + $0x138] sm:$0xff]  ;;  %v184_v7 = vld [vmem:[%s2231_s2 + $0x140] sm:$0xff]  ;;  %v57_v8 = vld [vmem:[%s2230_s1 + $0x148] sm:$0xff] }
  0x1f   :  { %689 = vst [vmem:[%s2232_s3 + $0xf0] sm:$0xff] %v561_v46  ;;  %v564_v61 = vadd.f32 %v436_v49, %v306_v48  ;;  %v438_v62 = vmul.f32 %v839_v9, %v179_v44  ;;  %v309_v63 = vmul.f32 %v820_v2, %v52_v45  ;;  %690 = vst [vmem:[%s2232_s3 + $0xf8] sm:$0xff] %v562_v53  ;;  %v185_v10 = vld [vmem:[%s2231_s2 + $0x148] sm:$0xff]  ;;  %v58_v15 = vld [vmem:[%s2230_s1 + $0x150] sm:$0xff] }
  0x20   :  { %v565_v3 = vadd.f32 %v437_v55, %v307_v54  ;;  %v439_v4 = vmul.f32 %v839_v9, %v180_v50  ;;  %v310_v5 = vmul.f32 %v820_v2, %v53_v51  ;;  %v440_v6 = vmul.f32 %v839_v9, %v181_v52  ;;  %691 = vst [vmem:[%s2232_s3 + $0x100] sm:$0xff] %v563_v60  ;;  %v186_v16 = vld [vmem:[%s2231_s2 + $0x150] sm:$0xff]  ;;  %v59_v17 = vld [vmem:[%s2230_s1 + $0x158] sm:$0xff]  ;;  %v60_v23 = vld [vmem:[%s2230_s1 + $0x160] sm:$0xff] }
  0x21   :  { %692 = vst [vmem:[%s2232_s3 + $0x108] sm:$0xff] %v564_v61  ;;  %v566_v11 = vadd.f32 %v438_v62, %v308_v56  ;;  %v311_v12 = vmul.f32 %v820_v2, %v54_v57  ;;  %v441_v13 = vmul.f32 %v839_v9, %v182_v58  ;;  %v312_v14 = vmul.f32 %v820_v2, %v55_v59  ;;  %v187_v22 = vld [vmem:[%s2231_s2 + $0x158] sm:$0xff]  ;;  %v188_v28 = vld [vmem:[%s2231_s2 + $0x160] sm:$0xff]  ;;  %v61_v29 = vld [vmem:[%s2230_s1 + $0x168] sm:$0xff] }
  0x22   :  { %693 = vst [vmem:[%s2232_s3 + $0x110] sm:$0xff] %v565_v3  ;;  %v567_v18 = vadd.f32 %v439_v4, %v309_v63  ;;  %v568_v19 = vadd.f32 %v440_v6, %v310_v5  ;;  %v442_v20 = vmul.f32 %v839_v9, %v183_v0  ;;  %v313_v21 = vmul.f32 %v820_v2, %v56_v1  ;;  %v189_v30 = vld [vmem:[%s2231_s2 + $0x168] sm:$0xff]  ;;  %v62_v35 = vld [vmem:[%s2230_s1 + $0x170] sm:$0xff]  ;;  %v63_v37 = vld [vmem:[%s2230_s1 + $0x178] sm:$0xff] }
  0x23   :  { %694 = vst [vmem:[%s2232_s3 + $0x118] sm:$0xff] %v566_v11  ;;  %v569_v24 = vadd.f32 %v441_v13, %v311_v12  ;;  %v443_v25 = vmul.f32 %v839_v9, %v184_v7  ;;  %v314_v26 = vmul.f32 %v820_v2, %v57_v8  ;;  %v444_v27 = vmul.f32 %v839_v9, %v185_v10  ;;  %v190_v36 = vld [vmem:[%s2231_s2 + $0x170] sm:$0xff]  ;;  %v191_v42 = vld [vmem:[%s2231_s2 + $0x178] sm:$0xff]  ;;  %v64_v43 = vld [vmem:[%s2230_s1 + $0x180] sm:$0xff] }
  0x24   :  { %695 = vst [vmem:[%s2232_s3 + $0x120] sm:$0xff] %v567_v18  ;;  %696 = vst [vmem:[%s2232_s3 + $0x128] sm:$0xff] %v568_v19  ;;  %v570_v31 = vadd.f32 %v442_v20, %v312_v14  ;;  %v315_v32 = vmul.f32 %v820_v2, %v58_v15  ;;  %v445_v33 = vmul.f32 %v839_v9, %v186_v16  ;;  %v192_v48 = vld [vmem:[%s2231_s2 + $0x180] sm:$0xff]  ;;  %v65_v49 = vld [vmem:[%s2230_s1 + $0x188] sm:$0xff] }
  0x25   :  { %v316_v34 = vmul.f32 %v820_v2, %v59_v17  ;;  %697 = vst [vmem:[%s2232_s3 + $0x130] sm:$0xff] %v569_v24  ;;  %v571_v38 = vadd.f32 %v443_v25, %v313_v21  ;;  %v572_v39 = vadd.f32 %v444_v27, %v314_v26  ;;  %v446_v40 = vmul.f32 %v839_v9, %v187_v22  ;;  %v193_v50 = vld [vmem:[%s2231_s2 + $0x188] sm:$0xff]  ;;  %v66_v55 = vld [vmem:[%s2230_s1 + $0x190] sm:$0xff]  ;;  %v67_v57 = vld [vmem:[%s2230_s1 + $0x198] sm:$0xff] }
  0x26   :  { %v317_v41 = vmul.f32 %v820_v2, %v60_v23  ;;  %698 = vst [vmem:[%s2232_s3 + $0x138] sm:$0xff] %v570_v31  ;;  %v573_v44 = vadd.f32 %v445_v33, %v315_v32  ;;  %v447_v45 = vmul.f32 %v839_v9, %v188_v28  ;;  %v318_v46 = vmul.f32 %v820_v2, %v61_v29  ;;  %v194_v56 = vld [vmem:[%s2231_s2 + $0x190] sm:$0xff]  ;;  %v195_v62 = vld [vmem:[%s2231_s2 + $0x198] sm:$0xff]  ;;  %v68_v63 = vld [vmem:[%s2230_s1 + $0x1a0] sm:$0xff] }
  0x27   :  { %v448_v47 = vmul.f32 %v839_v9, %v189_v30  ;;  %699 = vst [vmem:[%s2232_s3 + $0x140] sm:$0xff] %v571_v38  ;;  %700 = vst [vmem:[%s2232_s3 + $0x148] sm:$0xff] %v572_v39  ;;  %v574_v51 = vadd.f32 %v446_v40, %v316_v34  ;;  %v319_v52 = vmul.f32 %v820_v2, %v62_v35  ;;  %v196_v5 = vld [vmem:[%s2231_s2 + $0x1a0] sm:$0xff]  ;;  %v69_v6 = vld [vmem:[%s2230_s1 + $0x1a8] sm:$0xff] }
  0x28   :  { %v449_v53 = vmul.f32 %v839_v9, %v190_v36  ;;  %v320_v54 = vmul.f32 %v820_v2, %v63_v37  ;;  %701 = vst [vmem:[%s2232_s3 + $0x150] sm:$0xff] %v573_v44  ;;  %v575_v58 = vadd.f32 %v447_v45, %v317_v41  ;;  %v450_v60 = vmul.f32 %v839_v9, %v191_v42  ;;  %v197_v7 = vld [vmem:[%s2231_s2 + $0x1a8] sm:$0xff]  ;;  %v70_v13 = vld [vmem:[%s2230_s1 + $0x1b0] sm:$0xff]  ;;  %v71_v15 = vld [vmem:[%s2230_s1 + $0x1b8] sm:$0xff] }
  0x29   :  { %v576_v59 = vadd.f32 %v448_v47, %v318_v46  ;;  %v321_v61 = vmul.f32 %v820_v2, %v64_v43  ;;  %702 = vst [vmem:[%s2232_s3 + $0x158] sm:$0xff] %v574_v51  ;;  %v451_v1 = vmul.f32 %v839_v9, %v192_v48  ;;  %v322_v3 = vmul.f32 %v820_v2, %v65_v49  ;;  %v198_v14 = vld [vmem:[%s2231_s2 + $0x1b0] sm:$0xff]  ;;  %v199_v20 = vld [vmem:[%s2231_s2 + $0x1b8] sm:$0xff]  ;;  %v72_v21 = vld [vmem:[%s2230_s1 + $0x1c0] sm:$0xff] }
  0x2a   :  { %v577_v0 = vadd.f32 %v449_v53, %v319_v52  ;;  %v452_v4 = vmul.f32 %v839_v9, %v193_v50  ;;  %703 = vst [vmem:[%s2232_s3 + $0x160] sm:$0xff] %v575_v58  ;;  %v578_v8 = vadd.f32 %v450_v60, %v320_v54  ;;  %v323_v10 = vmul.f32 %v820_v2, %v66_v55  ;;  %v200_v26 = vld [vmem:[%s2231_s2 + $0x1c0] sm:$0xff]  ;;  %v73_v27 = vld [vmem:[%s2230_s1 + $0x1c8] sm:$0xff]  ;;  %v74_v33 = vld [vmem:[%s2230_s1 + $0x1d0] sm:$0xff] }
  0x2b   :  { %704 = vst [vmem:[%s2232_s3 + $0x168] sm:$0xff] %v576_v59  ;;  %v453_v11 = vmul.f32 %v839_v9, %v194_v56  ;;  %v324_v12 = vmul.f32 %v820_v2, %v67_v57  ;;  %v579_v16 = vadd.f32 %v451_v1, %v321_v61  ;;  %v454_v18 = vmul.f32 %v839_v9, %v195_v62  ;;  %v201_v28 = vld [vmem:[%s2231_s2 + $0x1c8] sm:$0xff]  ;;  %v202_v34 = vld [vmem:[%s2231_s2 + $0x1d0] sm:$0xff]  ;;  %v75_v35 = vld [vmem:[%s2230_s1 + $0x1d8] sm:$0xff] }
  0x2c   :  { %705 = vst [vmem:[%s2232_s3 + $0x170] sm:$0xff] %v577_v0  ;;  %v580_v17 = vadd.f32 %v452_v4, %v322_v3  ;;  %v325_v19 = vmul.f32 %v820_v2, %v68_v63  ;;  %706 = vst [vmem:[%s2232_s3 + $0x178] sm:$0xff] %v578_v8  ;;  %v455_v23 = vmul.f32 %v839_v9, %v196_v5  ;;  %v203_v40 = vld [vmem:[%s2231_s2 + $0x1d8] sm:$0xff]  ;;  %v76_v41 = vld [vmem:[%s2230_s1 + $0x1e0] sm:$0xff] }
  0x2d   :  { %v581_v22 = vadd.f32 %v453_v11, %v323_v10  ;;  %v326_v24 = vmul.f32 %v820_v2, %v69_v6  ;;  %v456_v25 = vmul.f32 %v839_v9, %v197_v7  ;;  %707 = vst [vmem:[%s2232_s3 + $0x180] sm:$0xff] %v579_v16  ;;  %v582_v29 = vadd.f32 %v454_v18, %v324_v12  ;;  %v204_v46 = vld [vmem:[%s2231_s2 + $0x1e0] sm:$0xff]  ;;  %v77_v47 = vld [vmem:[%s2230_s1 + $0x1e8] sm:$0xff]  ;;  %v78_v53 = vld [vmem:[%s2230_s1 + $0x1f0] sm:$0xff] }
  0x2e   :  { %708 = vst [vmem:[%s2232_s3 + $0x188] sm:$0xff] %v580_v17  ;;  %v327_v30 = vmul.f32 %v820_v2, %v70_v13  ;;  %v457_v31 = vmul.f32 %v839_v9, %v198_v14  ;;  %v328_v32 = vmul.f32 %v820_v2, %v71_v15  ;;  %v583_v36 = vadd.f32 %v455_v23, %v325_v19  ;;  %v205_v48 = vld [vmem:[%s2231_s2 + $0x1e8] sm:$0xff]  ;;  %v206_v54 = vld [vmem:[%s2231_s2 + $0x1f0] sm:$0xff]  ;;  %v79_v55 = vld [vmem:[%s2230_s1 + $0x1f8] sm:$0xff] }
  0x2f   :  { %709 = vst [vmem:[%s2232_s3 + $0x190] sm:$0xff] %v581_v22  ;;  %v584_v37 = vadd.f32 %v456_v25, %v326_v24  ;;  %v458_v38 = vmul.f32 %v839_v9, %v199_v20  ;;  %v329_v39 = vmul.f32 %v820_v2, %v72_v21  ;;  %710 = vst [vmem:[%s2232_s3 + $0x198] sm:$0xff] %v582_v29  ;;  %v207_v60 = vld [vmem:[%s2231_s2 + $0x1f8] sm:$0xff]  ;;  %v80_v61 = vld [vmem:[%s2230_s1 + $0x200] sm:$0xff] }
  0x30   :  { %v585_v42 = vadd.f32 %v457_v31, %v327_v30  ;;  %v459_v43 = vmul.f32 %v839_v9, %v200_v26  ;;  %v330_v44 = vmul.f32 %v820_v2, %v73_v27  ;;  %v460_v45 = vmul.f32 %v839_v9, %v201_v28  ;;  %711 = vst [vmem:[%s2232_s3 + $0x1a0] sm:$0xff] %v583_v36  ;;  %v208_v3 = vld [vmem:[%s2231_s2 + $0x200] sm:$0xff]  ;;  %v81_v4 = vld [vmem:[%s2230_s1 + $0x208] sm:$0xff]  ;;  %v82_v11 = vld [vmem:[%s2230_s1 + $0x210] sm:$0xff] }
  0x31   :  { %712 = vst [vmem:[%s2232_s3 + $0x1a8] sm:$0xff] %v584_v37  ;;  %v586_v49 = vadd.f32 %v458_v38, %v328_v32  ;;  %v331_v50 = vmul.f32 %v820_v2, %v74_v33  ;;  %v461_v51 = vmul.f32 %v839_v9, %v202_v34  ;;  %v332_v52 = vmul.f32 %v820_v2, %v75_v35  ;;  %v209_v5 = vld [vmem:[%s2231_s2 + $0x208] sm:$0xff]  ;;  %v210_v12 = vld [vmem:[%s2231_s2 + $0x210] sm:$0xff]  ;;  %v83_v13 = vld [vmem:[%s2230_s1 + $0x218] sm:$0xff] }
  0x32   :  { %713 = vst [vmem:[%s2232_s3 + $0x1b0] sm:$0xff] %v585_v42  ;;  %v587_v56 = vadd.f32 %v459_v43, %v329_v39  ;;  %v588_v57 = vadd.f32 %v460_v45, %v330_v44  ;;  %v462_v58 = vmul.f32 %v839_v9, %v203_v40  ;;  %v333_v59 = vmul.f32 %v820_v2, %v76_v41  ;;  %v211_v18 = vld [vmem:[%s2231_s2 + $0x218] sm:$0xff]  ;;  %v84_v19 = vld [vmem:[%s2230_s1 + $0x220] sm:$0xff]  ;;  %v85_v25 = vld [vmem:[%s2230_s1 + $0x228] sm:$0xff] }
  0x33   :  { %714 = vst [vmem:[%s2232_s3 + $0x1b8] sm:$0xff] %v586_v49  ;;  %v589_v62 = vadd.f32 %v461_v51, %v331_v50  ;;  %v463_v63 = vmul.f32 %v839_v9, %v204_v46  ;;  %v334_v0 = vmul.f32 %v820_v2, %v77_v47  ;;  %v464_v1 = vmul.f32 %v839_v9, %v205_v48  ;;  %v212_v24 = vld [vmem:[%s2231_s2 + $0x220] sm:$0xff]  ;;  %v213_v26 = vld [vmem:[%s2231_s2 + $0x228] sm:$0xff]  ;;  %v86_v31 = vld [vmem:[%s2230_s1 + $0x230] sm:$0xff] }
  0x34   :  { %715 = vst [vmem:[%s2232_s3 + $0x1c0] sm:$0xff] %v587_v56  ;;  %716 = vst [vmem:[%s2232_s3 + $0x1c8] sm:$0xff] %v588_v57  ;;  %v590_v6 = vadd.f32 %v462_v58, %v332_v52  ;;  %v335_v7 = vmul.f32 %v820_v2, %v78_v53  ;;  %v465_v8 = vmul.f32 %v839_v9, %v206_v54  ;;  %v214_v32 = vld [vmem:[%s2231_s2 + $0x230] sm:$0xff]  ;;  %v87_v33 = vld [vmem:[%s2230_s1 + $0x238] sm:$0xff] }
  0x35   :  { %v336_v10 = vmul.f32 %v820_v2, %v79_v55  ;;  %717 = vst [vmem:[%s2232_s3 + $0x1d0] sm:$0xff] %v589_v62  ;;  %v591_v14 = vadd.f32 %v463_v63, %v333_v59  ;;  %v592_v15 = vadd.f32 %v464_v1, %v334_v0  ;;  %v466_v16 = vmul.f32 %v839_v9, %v207_v60  ;;  %v215_v38 = vld [vmem:[%s2231_s2 + $0x238] sm:$0xff]  ;;  %v88_v39 = vld [vmem:[%s2230_s1 + $0x240] sm:$0xff]  ;;  %v89_v45 = vld [vmem:[%s2230_s1 + $0x248] sm:$0xff] }
  0x36   :  { %v337_v17 = vmul.f32 %v820_v2, %v80_v61  ;;  %718 = vst [vmem:[%s2232_s3 + $0x1d8] sm:$0xff] %v590_v6  ;;  %v593_v20 = vadd.f32 %v465_v8, %v335_v7  ;;  %v467_v21 = vmul.f32 %v839_v9, %v208_v3  ;;  %v338_v22 = vmul.f32 %v820_v2, %v81_v4  ;;  %v216_v44 = vld [vmem:[%s2231_s2 + $0x240] sm:$0xff]  ;;  %v217_v46 = vld [vmem:[%s2231_s2 + $0x248] sm:$0xff]  ;;  %v90_v51 = vld [vmem:[%s2230_s1 + $0x250] sm:$0xff] }
  0x37   :  { %v468_v23 = vmul.f32 %v839_v9, %v209_v5  ;;  %719 = vst [vmem:[%s2232_s3 + $0x1e0] sm:$0xff] %v591_v14  ;;  %720 = vst [vmem:[%s2232_s3 + $0x1e8] sm:$0xff] %v592_v15  ;;  %v594_v27 = vadd.f32 %v466_v16, %v336_v10  ;;  %v339_v28 = vmul.f32 %v820_v2, %v82_v11  ;;  %v218_v52 = vld [vmem:[%s2231_s2 + $0x250] sm:$0xff]  ;;  %v91_v53 = vld [vmem:[%s2230_s1 + $0x258] sm:$0xff] }
  0x38   :  { %v469_v29 = vmul.f32 %v839_v9, %v210_v12  ;;  %v340_v30 = vmul.f32 %v820_v2, %v83_v13  ;;  %721 = vst [vmem:[%s2232_s3 + $0x1f0] sm:$0xff] %v593_v20  ;;  %v595_v34 = vadd.f32 %v467_v21, %v337_v17  ;;  %v470_v36 = vmul.f32 %v839_v9, %v211_v18  ;;  %v219_v58 = vld [vmem:[%s2231_s2 + $0x258] sm:$0xff]  ;;  %v92_v59 = vld [vmem:[%s2230_s1 + $0x260] sm:$0xff]  ;;  %v93_v1 = vld [vmem:[%s2230_s1 + $0x268] sm:$0xff] }
  0x39   :  { %v596_v35 = vadd.f32 %v468_v23, %v338_v22  ;;  %v341_v37 = vmul.f32 %v820_v2, %v84_v19  ;;  %722 = vst [vmem:[%s2232_s3 + $0x1f8] sm:$0xff] %v594_v27  ;;  %v471_v41 = vmul.f32 %v839_v9, %v212_v24  ;;  %v342_v42 = vmul.f32 %v820_v2, %v85_v25  ;;  %v220_v0 = vld [vmem:[%s2231_s2 + $0x260] sm:$0xff]  ;;  %v221_v3 = vld [vmem:[%s2231_s2 + $0x268] sm:$0xff]  ;;  %v94_v8 = vld [vmem:[%s2230_s1 + $0x270] sm:$0xff] }
  0x3a   :  { %v597_v40 = vadd.f32 %v469_v29, %v339_v28  ;;  %v472_v43 = vmul.f32 %v839_v9, %v213_v26  ;;  %723 = vst [vmem:[%s2232_s3 + $0x200] sm:$0xff] %v595_v34  ;;  %v598_v47 = vadd.f32 %v470_v36, %v340_v30  ;;  %v343_v48 = vmul.f32 %v820_v2, %v86_v31  ;;  %v222_v10 = vld [vmem:[%s2231_s2 + $0x270] sm:$0xff]  ;;  %v95_v11 = vld [vmem:[%s2230_s1 + $0x278] sm:$0xff]  ;;  %v96_v17 = vld [vmem:[%s2230_s1 + $0x280] sm:$0xff] }
  0x3b   :  { %724 = vst [vmem:[%s2232_s3 + $0x208] sm:$0xff] %v596_v35  ;;  %v473_v49 = vmul.f32 %v839_v9, %v214_v32  ;;  %v344_v50 = vmul.f32 %v820_v2, %v87_v33  ;;  %v599_v54 = vadd.f32 %v471_v41, %v341_v37  ;;  %v474_v56 = vmul.f32 %v839_v9, %v215_v38  ;;  %v223_v16 = vld [vmem:[%s2231_s2 + $0x278] sm:$0xff]  ;;  %v224_v22 = vld [vmem:[%s2231_s2 + $0x280] sm:$0xff]  ;;  %v97_v23 = vld [vmem:[%s2230_s1 + $0x288] sm:$0xff] }
  0x3c   :  { %725 = vst [vmem:[%s2232_s3 + $0x210] sm:$0xff] %v597_v40  ;;  %v600_v55 = vadd.f32 %v472_v43, %v342_v42  ;;  %v345_v57 = vmul.f32 %v820_v2, %v88_v39  ;;  %726 = vst [vmem:[%s2232_s3 + $0x218] sm:$0xff] %v598_v47  ;;  %v475_v61 = vmul.f32 %v839_v9, %v216_v44  ;;  %v225_v24 = vld [vmem:[%s2231_s2 + $0x288] sm:$0xff]  ;;  %v98_v29 = vld [vmem:[%s2230_s1 + $0x290] sm:$0xff] }
  0x3d   :  { %v601_v60 = vadd.f32 %v473_v49, %v343_v48  ;;  %v346_v62 = vmul.f32 %v820_v2, %v89_v45  ;;  %v476_v63 = vmul.f32 %v839_v9, %v217_v46  ;;  %727 = vst [vmem:[%s2232_s3 + $0x220] sm:$0xff] %v599_v54  ;;  %v602_v4 = vadd.f32 %v474_v56, %v344_v50  ;;  %v226_v30 = vld [vmem:[%s2231_s2 + $0x290] sm:$0xff]  ;;  %v99_v31 = vld [vmem:[%s2230_s1 + $0x298] sm:$0xff]  ;;  %v100_v37 = vld [vmem:[%s2230_s1 + $0x2a0] sm:$0xff] }
  0x3e   :  { %728 = vst [vmem:[%s2232_s3 + $0x228] sm:$0xff] %v600_v55  ;;  %v347_v5 = vmul.f32 %v820_v2, %v90_v51  ;;  %v477_v6 = vmul.f32 %v839_v9, %v218_v52  ;;  %v348_v7 = vmul.f32 %v820_v2, %v91_v53  ;;  %v603_v12 = vadd.f32 %v475_v61, %v345_v57  ;;  %v227_v36 = vld [vmem:[%s2231_s2 + $0x298] sm:$0xff]  ;;  %v228_v42 = vld [vmem:[%s2231_s2 + $0x2a0] sm:$0xff]  ;;  %v101_v43 = vld [vmem:[%s2230_s1 + $0x2a8] sm:$0xff] }
  0x3f   :  { %729 = vst [vmem:[%s2232_s3 + $0x230] sm:$0xff] %v601_v60  ;;  %v604_v13 = vadd.f32 %v476_v63, %v346_v62  ;;  %v478_v14 = vmul.f32 %v839_v9, %v219_v58  ;;  %v349_v15 = vmul.f32 %v820_v2, %v92_v59  ;;  %730 = vst [vmem:[%s2232_s3 + $0x238] sm:$0xff] %v602_v4  ;;  %v229_v44 = vld [vmem:[%s2231_s2 + $0x2a8] sm:$0xff]  ;;  %v102_v49 = vld [vmem:[%s2230_s1 + $0x2b0] sm:$0xff] }
  0x40   :  { %v605_v18 = vadd.f32 %v477_v6, %v347_v5  ;;  %v479_v19 = vmul.f32 %v839_v9, %v220_v0  ;;  %v350_v20 = vmul.f32 %v820_v2, %v93_v1  ;;  %v480_v21 = vmul.f32 %v839_v9, %v221_v3  ;;  %731 = vst [vmem:[%s2232_s3 + $0x240] sm:$0xff] %v603_v12  ;;  %v230_v50 = vld [vmem:[%s2231_s2 + $0x2b0] sm:$0xff]  ;;  %v103_v51 = vld [vmem:[%s2230_s1 + $0x2b8] sm:$0xff]  ;;  %v104_v57 = vld [vmem:[%s2230_s1 + $0x2c0] sm:$0xff] }
  0x41   :  { %732 = vst [vmem:[%s2232_s3 + $0x248] sm:$0xff] %v604_v13  ;;  %v606_v25 = vadd.f32 %v478_v14, %v348_v7  ;;  %v351_v26 = vmul.f32 %v820_v2, %v94_v8  ;;  %v481_v27 = vmul.f32 %v839_v9, %v222_v10  ;;  %v352_v28 = vmul.f32 %v820_v2, %v95_v11  ;;  %v231_v56 = vld [vmem:[%s2231_s2 + $0x2b8] sm:$0xff]  ;;  %v232_v62 = vld [vmem:[%s2231_s2 + $0x2c0] sm:$0xff]  ;;  %v105_v63 = vld [vmem:[%s2230_s1 + $0x2c8] sm:$0xff] }
  0x42   :  { %733 = vst [vmem:[%s2232_s3 + $0x250] sm:$0xff] %v605_v18  ;;  %v607_v32 = vadd.f32 %v479_v19, %v349_v15  ;;  %v608_v33 = vadd.f32 %v480_v21, %v350_v20  ;;  %v482_v34 = vmul.f32 %v839_v9, %v223_v16  ;;  %v353_v35 = vmul.f32 %v820_v2, %v96_v17  ;;  %v233_v0 = vld [vmem:[%s2231_s2 + $0x2c8] sm:$0xff]  ;;  %v106_v6 = vld [vmem:[%s2230_s1 + $0x2d0] sm:$0xff]  ;;  %v107_v8 = vld [vmem:[%s2230_s1 + $0x2d8] sm:$0xff] }
  0x43   :  { %734 = vst [vmem:[%s2232_s3 + $0x258] sm:$0xff] %v606_v25  ;;  %v609_v38 = vadd.f32 %v481_v27, %v351_v26  ;;  %v483_v39 = vmul.f32 %v839_v9, %v224_v22  ;;  %v354_v40 = vmul.f32 %v820_v2, %v97_v23  ;;  %v484_v41 = vmul.f32 %v839_v9, %v225_v24  ;;  %v234_v7 = vld [vmem:[%s2231_s2 + $0x2d0] sm:$0xff]  ;;  %v235_v14 = vld [vmem:[%s2231_s2 + $0x2d8] sm:$0xff]  ;;  %v108_v15 = vld [vmem:[%s2230_s1 + $0x2e0] sm:$0xff] }
  0x44   :  { %735 = vst [vmem:[%s2232_s3 + $0x260] sm:$0xff] %v607_v32  ;;  %736 = vst [vmem:[%s2232_s3 + $0x268] sm:$0xff] %v608_v33  ;;  %v610_v45 = vadd.f32 %v482_v34, %v352_v28  ;;  %v355_v46 = vmul.f32 %v820_v2, %v98_v29  ;;  %v485_v47 = vmul.f32 %v839_v9, %v226_v30  ;;  %v236_v20 = vld [vmem:[%s2231_s2 + $0x2e0] sm:$0xff]  ;;  %v109_v21 = vld [vmem:[%s2230_s1 + $0x2e8] sm:$0xff] }
  0x45   :  { %v356_v48 = vmul.f32 %v820_v2, %v99_v31  ;;  %737 = vst [vmem:[%s2232_s3 + $0x270] sm:$0xff] %v609_v38  ;;  %v611_v52 = vadd.f32 %v483_v39, %v353_v35  ;;  %v612_v53 = vadd.f32 %v484_v41, %v354_v40  ;;  %v486_v54 = vmul.f32 %v839_v9, %v227_v36  ;;  %v237_v22 = vld [vmem:[%s2231_s2 + $0x2e8] sm:$0xff]  ;;  %v110_v27 = vld [vmem:[%s2230_s1 + $0x2f0] sm:$0xff]  ;;  %v111_v29 = vld [vmem:[%s2230_s1 + $0x2f8] sm:$0xff] }
  0x46   :  { %v357_v55 = vmul.f32 %v820_v2, %v100_v37  ;;  %738 = vst [vmem:[%s2232_s3 + $0x278] sm:$0xff] %v610_v45  ;;  %v613_v58 = vadd.f32 %v485_v47, %v355_v46  ;;  %v487_v59 = vmul.f32 %v839_v9, %v228_v42  ;;  %v358_v60 = vmul.f32 %v820_v2, %v101_v43  ;;  %v238_v28 = vld [vmem:[%s2231_s2 + $0x2f0] sm:$0xff]  ;;  %v239_v34 = vld [vmem:[%s2231_s2 + $0x2f8] sm:$0xff]  ;;  %v112_v35 = vld [vmem:[%s2230_s1 + $0x300] sm:$0xff] }
  0x47   :  { %v488_v61 = vmul.f32 %v839_v9, %v229_v44  ;;  %739 = vst [vmem:[%s2232_s3 + $0x280] sm:$0xff] %v611_v52  ;;  %740 = vst [vmem:[%s2232_s3 + $0x288] sm:$0xff] %v612_v53  ;;  %v614_v1 = vadd.f32 %v486_v54, %v356_v48  ;;  %v359_v3 = vmul.f32 %v820_v2, %v102_v49  ;;  %v240_v40 = vld [vmem:[%s2231_s2 + $0x300] sm:$0xff]  ;;  %v113_v41 = vld [vmem:[%s2230_s1 + $0x308] sm:$0xff] }
  0x48   :  { %v489_v4 = vmul.f32 %v839_v9, %v230_v50  ;;  %v360_v5 = vmul.f32 %v820_v2, %v103_v51  ;;  %741 = vst [vmem:[%s2232_s3 + $0x290] sm:$0xff] %v613_v58  ;;  %v615_v10 = vadd.f32 %v487_v59, %v357_v55  ;;  %v490_v12 = vmul.f32 %v839_v9, %v231_v56  ;;  %v241_v42 = vld [vmem:[%s2231_s2 + $0x308] sm:$0xff]  ;;  %v114_v47 = vld [vmem:[%s2230_s1 + $0x310] sm:$0xff]  ;;  %v115_v49 = vld [vmem:[%s2230_s1 + $0x318] sm:$0xff] }
  0x49   :  { %v616_v11 = vadd.f32 %v488_v61, %v358_v60  ;;  %v361_v13 = vmul.f32 %v820_v2, %v104_v57  ;;  %742 = vst [vmem:[%s2232_s3 + $0x298] sm:$0xff] %v614_v1  ;;  %v491_v17 = vmul.f32 %v839_v9, %v232_v62  ;;  %v362_v18 = vmul.f32 %v820_v2, %v105_v63  ;;  %v242_v48 = vld [vmem:[%s2231_s2 + $0x310] sm:$0xff]  ;;  %v243_v54 = vld [vmem:[%s2231_s2 + $0x318] sm:$0xff]  ;;  %v116_v55 = vld [vmem:[%s2230_s1 + $0x320] sm:$0xff] }
  0x4a   :  { %v617_v16 = vadd.f32 %v489_v4, %v359_v3  ;;  %v492_v19 = vmul.f32 %v839_v9, %v233_v0  ;;  %743 = vst [vmem:[%s2232_s3 + $0x2a0] sm:$0xff] %v615_v10  ;;  %v618_v23 = vadd.f32 %v490_v12, %v360_v5  ;;  %v363_v24 = vmul.f32 %v820_v2, %v106_v6  ;;  %v244_v60 = vld [vmem:[%s2231_s2 + $0x320] sm:$0xff]  ;;  %v117_v61 = vld [vmem:[%s2230_s1 + $0x328] sm:$0xff]  ;;  %v118_v4 = vld [vmem:[%s2230_s1 + $0x330] sm:$0xff] }
  0x4b   :  { %744 = vst [vmem:[%s2232_s3 + $0x2a8] sm:$0xff] %v616_v11  ;;  %v493_v25 = vmul.f32 %v839_v9, %v234_v7  ;;  %v364_v26 = vmul.f32 %v820_v2, %v107_v8  ;;  %v619_v30 = vadd.f32 %v491_v17, %v361_v13  ;;  %v494_v32 = vmul.f32 %v839_v9, %v235_v14  ;;  %v245_v62 = vld [vmem:[%s2231_s2 + $0x328] sm:$0xff]  ;;  %v246_v5 = vld [vmem:[%s2231_s2 + $0x330] sm:$0xff]  ;;  %v119_v6 = vld [vmem:[%s2230_s1 + $0x338] sm:$0xff] }
  0x4c   :  { %745 = vst [vmem:[%s2232_s3 + $0x2b0] sm:$0xff] %v617_v16  ;;  %v620_v31 = vadd.f32 %v492_v19, %v362_v18  ;;  %v365_v33 = vmul.f32 %v820_v2, %v108_v15  ;;  %746 = vst [vmem:[%s2232_s3 + $0x2b8] sm:$0xff] %v618_v23  ;;  %v495_v37 = vmul.f32 %v839_v9, %v236_v20  ;;  %v247_v12 = vld [vmem:[%s2231_s2 + $0x338] sm:$0xff]  ;;  %v120_v13 = vld [vmem:[%s2230_s1 + $0x340] sm:$0xff] }
  0x4d   :  { %v621_v36 = vadd.f32 %v493_v25, %v363_v24  ;;  %v366_v38 = vmul.f32 %v820_v2, %v109_v21  ;;  %v496_v39 = vmul.f32 %v839_v9, %v237_v22  ;;  %747 = vst [vmem:[%s2232_s3 + $0x2c0] sm:$0xff] %v619_v30  ;;  %v622_v43 = vadd.f32 %v494_v32, %v364_v26  ;;  %v248_v18 = vld [vmem:[%s2231_s2 + $0x340] sm:$0xff]  ;;  %v121_v19 = vld [vmem:[%s2230_s1 + $0x348] sm:$0xff]  ;;  %v122_v25 = vld [vmem:[%s2230_s1 + $0x350] sm:$0xff] }
  0x4e   :  { %748 = vst [vmem:[%s2232_s3 + $0x2c8] sm:$0xff] %v620_v31  ;;  %v367_v44 = vmul.f32 %v820_v2, %v110_v27  ;;  %v497_v45 = vmul.f32 %v839_v9, %v238_v28  ;;  %v368_v46 = vmul.f32 %v820_v2, %v111_v29  ;;  %v623_v50 = vadd.f32 %v495_v37, %v365_v33  ;;  %v249_v20 = vld [vmem:[%s2231_s2 + $0x348] sm:$0xff]  ;;  %v250_v26 = vld [vmem:[%s2231_s2 + $0x350] sm:$0xff]  ;;  %v123_v27 = vld [vmem:[%s2230_s1 + $0x358] sm:$0xff] }
  0x4f   :  { %749 = vst [vmem:[%s2232_s3 + $0x2d0] sm:$0xff] %v621_v36  ;;  %v624_v51 = vadd.f32 %v496_v39, %v366_v38  ;;  %v498_v52 = vmul.f32 %v839_v9, %v239_v34  ;;  %v369_v53 = vmul.f32 %v820_v2, %v112_v35  ;;  %750 = vst [vmem:[%s2232_s3 + $0x2d8] sm:$0xff] %v622_v43  ;;  %v251_v32 = vld [vmem:[%s2231_s2 + $0x358] sm:$0xff]  ;;  %v124_v33 = vld [vmem:[%s2230_s1 + $0x360] sm:$0xff] }
  0x50   :  { %v625_v56 = vadd.f32 %v497_v45, %v367_v44  ;;  %v499_v57 = vmul.f32 %v839_v9, %v240_v40  ;;  %v370_v58 = vmul.f32 %v820_v2, %v113_v41  ;;  %v500_v59 = vmul.f32 %v839_v9, %v241_v42  ;;  %751 = vst [vmem:[%s2232_s3 + $0x2e0] sm:$0xff] %v623_v50  ;;  %v252_v38 = vld [vmem:[%s2231_s2 + $0x360] sm:$0xff]  ;;  %v125_v39 = vld [vmem:[%s2230_s1 + $0x368] sm:$0xff]  ;;  %v126_v45 = vld [vmem:[%s2230_s1 + $0x370] sm:$0xff] }
  0x51   :  { %752 = vst [vmem:[%s2232_s3 + $0x2e8] sm:$0xff] %v624_v51  ;;  %v626_v63 = vadd.f32 %v498_v52, %v368_v46  ;;  %v371_v0 = vmul.f32 %v820_v2, %v114_v47  ;;  %v501_v1 = vmul.f32 %v839_v9, %v242_v48  ;;  %v372_v3 = vmul.f32 %v820_v2, %v115_v49  ;;  %v253_v40 = vld [vmem:[%s2231_s2 + $0x368] sm:$0xff]  ;;  %v254_v46 = vld [vmem:[%s2231_s2 + $0x370] sm:$0xff]  ;;  %v127_v47 = vld [vmem:[%s2230_s1 + $0x378] sm:$0xff] }
  0x52   :  { %753 = vst [vmem:[%s2232_s3 + $0x2f0] sm:$0xff] %v625_v56  ;;  %v627_v7 = vadd.f32 %v499_v57, %v369_v53  ;;  %v628_v8 = vadd.f32 %v500_v59, %v370_v58  ;;  %v502_v10 = vmul.f32 %v839_v9, %v243_v54  ;;  %v373_v11 = vmul.f32 %v820_v2, %v116_v55  ;;  %v255_v52 = vld [vmem:[%s2231_s2 + $0x378] sm:$0xff]  ;;  %v128_v53 = vld [vmem:[%s2230_s1 + $0x380] sm:$0xff]  ;;  %v129_v59 = vld [vmem:[%s2230_s1 + $0x388] sm:$0xff] }
  0x53   :  { %754 = vst [vmem:[%s2232_s3 + $0x2f8] sm:$0xff] %v626_v63  ;;  %v629_v14 = vadd.f32 %v501_v1, %v371_v0  ;;  %v503_v15 = vmul.f32 %v839_v9, %v244_v60  ;;  %v374_v16 = vmul.f32 %v820_v2, %v117_v61  ;;  %v504_v17 = vmul.f32 %v839_v9, %v245_v62  ;;  %v256_v58 = vld [vmem:[%s2231_s2 + $0x380] sm:$0xff]  ;;  %v257_v60 = vld [vmem:[%s2231_s2 + $0x388] sm:$0xff]  ;;  %v130_v1 = vld [vmem:[%s2230_s1 + $0x390] sm:$0xff] }
  0x54   :  { %755 = vst [vmem:[%s2232_s3 + $0x300] sm:$0xff] %v627_v7  ;;  %756 = vst [vmem:[%s2232_s3 + $0x308] sm:$0xff] %v628_v8  ;;  %v630_v21 = vadd.f32 %v502_v10, %v372_v3  ;;  %v375_v22 = vmul.f32 %v820_v2, %v118_v4  ;;  %v505_v23 = vmul.f32 %v839_v9, %v246_v5  ;;  %v258_v3 = vld [vmem:[%s2231_s2 + $0x390] sm:$0xff]  ;;  %v131_v4 = vld [vmem:[%s2230_s1 + $0x398] sm:$0xff] }
  0x55   :  { %v376_v24 = vmul.f32 %v820_v2, %v119_v6  ;;  %757 = vst [vmem:[%s2232_s3 + $0x310] sm:$0xff] %v629_v14  ;;  %v631_v28 = vadd.f32 %v503_v15, %v373_v11  ;;  %v632_v29 = vadd.f32 %v504_v17, %v374_v16  ;;  %v506_v30 = vmul.f32 %v839_v9, %v247_v12  ;;  %v259_v10 = vld [vmem:[%s2231_s2 + $0x398] sm:$0xff]  ;;  %v132_v11 = vld [vmem:[%s2230_s1 + $0x3a0] sm:$0xff]  ;;  %v133_v17 = vld [vmem:[%s2230_s1 + $0x3a8] sm:$0xff] }
  0x56   :  { %v377_v31 = vmul.f32 %v820_v2, %v120_v13  ;;  %758 = vst [vmem:[%s2232_s3 + $0x318] sm:$0xff] %v630_v21  ;;  %v633_v34 = vadd.f32 %v505_v23, %v375_v22  ;;  %v507_v35 = vmul.f32 %v839_v9, %v248_v18  ;;  %v378_v36 = vmul.f32 %v820_v2, %v121_v19  ;;  %v260_v16 = vld [vmem:[%s2231_s2 + $0x3a0] sm:$0xff]  ;;  %v261_v18 = vld [vmem:[%s2231_s2 + $0x3a8] sm:$0xff]  ;;  %v134_v23 = vld [vmem:[%s2230_s1 + $0x3b0] sm:$0xff] }
  0x57   :  { %v508_v37 = vmul.f32 %v839_v9, %v249_v20  ;;  %759 = vst [vmem:[%s2232_s3 + $0x320] sm:$0xff] %v631_v28  ;;  %760 = vst [vmem:[%s2232_s3 + $0x328] sm:$0xff] %v632_v29  ;;  %v634_v41 = vadd.f32 %v506_v30, %v376_v24  ;;  %v379_v42 = vmul.f32 %v820_v2, %v122_v25  ;;  %v262_v24 = vld [vmem:[%s2231_s2 + $0x3b0] sm:$0xff]  ;;  %v135_v25 = vld [vmem:[%s2230_s1 + $0x3b8] sm:$0xff] }
  0x58   :  { %v509_v43 = vmul.f32 %v839_v9, %v250_v26  ;;  %v380_v44 = vmul.f32 %v820_v2, %v123_v27  ;;  %761 = vst [vmem:[%s2232_s3 + $0x330] sm:$0xff] %v633_v34  ;;  %v635_v48 = vadd.f32 %v507_v35, %v377_v31  ;;  %v510_v50 = vmul.f32 %v839_v9, %v251_v32  ;;  %v263_v30 = vld [vmem:[%s2231_s2 + $0x3b8] sm:$0xff]  ;;  %v136_v31 = vld [vmem:[%s2230_s1 + $0x3c0] sm:$0xff] }
  0x59   :  { %v636_v49 = vadd.f32 %v508_v37, %v378_v36  ;;  %v381_v51 = vmul.f32 %v820_v2, %v124_v33  ;;  %762 = vst [vmem:[%s2232_s3 + $0x338] sm:$0xff] %v634_v41  ;;  %v511_v55 = vmul.f32 %v839_v9, %v252_v38  ;;  %v382_v56 = vmul.f32 %v820_v2, %v125_v39  ;;  %v264_v36 = vld [vmem:[%s2231_s2 + $0x3c0] sm:$0xff]  ;;  %v137_v37 = vld [vmem:[%s2230_s1 + $0x3c8] sm:$0xff] }
  0x5a   :  { %v637_v54 = vadd.f32 %v509_v43, %v379_v42  ;;  %v512_v57 = vmul.f32 %v839_v9, %v253_v40  ;;  %763 = vst [vmem:[%s2232_s3 + $0x340] sm:$0xff] %v635_v48  ;;  %v638_v61 = vadd.f32 %v510_v50, %v380_v44  ;;  %v383_v62 = vmul.f32 %v820_v2, %v126_v45  ;;  %v265_v38 = vld [vmem:[%s2231_s2 + $0x3c8] sm:$0xff]  ;;  %v138_v43 = vld [vmem:[%s2230_s1 + $0x3d0] sm:$0xff]  ;;  %v139_v45 = vld [vmem:[%s2230_s1 + $0x3d8] sm:$0xff] }
  0x5b   :  { %764 = vst [vmem:[%s2232_s3 + $0x348] sm:$0xff] %v636_v49  ;;  %v513_v63 = vmul.f32 %v839_v9, %v254_v46  ;;  %v384_v0 = vmul.f32 %v820_v2, %v127_v47  ;;  %v639_v5 = vadd.f32 %v511_v55, %v381_v51  ;;  %v514_v7 = vmul.f32 %v839_v9, %v255_v52  ;;  %v266_v44 = vld [vmem:[%s2231_s2 + $0x3d0] sm:$0xff]  ;;  %v267_v50 = vld [vmem:[%s2231_s2 + $0x3d8] sm:$0xff]  ;;  %v140_v51 = vld [vmem:[%s2230_s1 + $0x3e0] sm:$0xff] }
  0x5c   :  { %765 = vst [vmem:[%s2232_s3 + $0x350] sm:$0xff] %v637_v54  ;;  %v640_v6 = vadd.f32 %v512_v57, %v382_v56  ;;  %v385_v8 = vmul.f32 %v820_v2, %v128_v53  ;;  %766 = vst [vmem:[%s2232_s3 + $0x358] sm:$0xff] %v638_v61  ;;  %v515_v13 = vmul.f32 %v839_v9, %v256_v58  ;;  %v268_v56 = vld [vmem:[%s2231_s2 + $0x3e0] sm:$0xff]  ;;  %v141_v57 = vld [vmem:[%s2230_s1 + $0x3e8] sm:$0xff] }
  0x5d   :  { %v641_v12 = vadd.f32 %v513_v63, %v383_v62  ;;  %v386_v14 = vmul.f32 %v820_v2, %v129_v59  ;;  %v516_v15 = vmul.f32 %v839_v9, %v257_v60  ;;  %767 = vst [vmem:[%s2232_s3 + $0x360] sm:$0xff] %v639_v5  ;;  %v642_v19 = vadd.f32 %v514_v7, %v384_v0  ;;  %v269_v58 = vld [vmem:[%s2231_s2 + $0x3e8] sm:$0xff]  ;;  %v142_v63 = vld [vmem:[%s2230_s1 + $0x3f0] sm:$0xff]  ;;  %v271_v7 = vld [vmem:[%s2231_s2 + $0x3f8] sm:$0xff] }
  0x5e   :  { %768 = vst [vmem:[%s2232_s3 + $0x368] sm:$0xff] %v640_v6  ;;  %v387_v20 = vmul.f32 %v820_v2, %v130_v1  ;;  %v517_v21 = vmul.f32 %v839_v9, %v258_v3  ;;  %v388_v22 = vmul.f32 %v820_v2, %v131_v4  ;;  %v643_v26 = vadd.f32 %v515_v13, %v385_v8  ;;  %v270_v0 = vld [vmem:[%s2231_s2 + $0x3f0] sm:$0xff]  ;;  %v143_v1 = vld [vmem:[%s2230_s1 + $0x3f8] sm:$0xff] }
  0x5f   :  { %769 = vst [vmem:[%s2232_s3 + $0x370] sm:$0xff] %v641_v12  ;;  %v644_v27 = vadd.f32 %v516_v15, %v386_v14  ;;  %v518_v28 = vmul.f32 %v839_v9, %v259_v10  ;;  %v389_v29 = vmul.f32 %v820_v2, %v132_v11  ;;  %770 = vst [vmem:[%s2232_s3 + $0x378] sm:$0xff] %v642_v19 }
  0x60   :  { %v645_v32 = vadd.f32 %v517_v21, %v387_v20  ;;  %v519_v33 = vmul.f32 %v839_v9, %v260_v16  ;;  %v390_v34 = vmul.f32 %v820_v2, %v133_v17  ;;  %v520_v35 = vmul.f32 %v839_v9, %v261_v18  ;;  %771 = vst [vmem:[%s2232_s3 + $0x380] sm:$0xff] %v643_v26 }
  0x61   :  { %772 = vst [vmem:[%s2232_s3 + $0x388] sm:$0xff] %v644_v27  ;;  %v646_v39 = vadd.f32 %v518_v28, %v388_v22  ;;  %v391_v40 = vmul.f32 %v820_v2, %v134_v23  ;;  %v521_v41 = vmul.f32 %v839_v9, %v262_v24  ;;  %v392_v42 = vmul.f32 %v820_v2, %v135_v25 }
  0x62   :  { %773 = vst [vmem:[%s2232_s3 + $0x390] sm:$0xff] %v645_v32  ;;  %v647_v46 = vadd.f32 %v519_v33, %v389_v29  ;;  %v648_v47 = vadd.f32 %v520_v35, %v390_v34  ;;  %v522_v48 = vmul.f32 %v839_v9, %v263_v30  ;;  %v393_v49 = vmul.f32 %v820_v2, %v136_v31 }
  0x63   :  { %774 = vst [vmem:[%s2232_s3 + $0x398] sm:$0xff] %v646_v39  ;;  %v649_v52 = vadd.f32 %v521_v41, %v391_v40  ;;  %v523_v53 = vmul.f32 %v839_v9, %v264_v36  ;;  %v394_v54 = vmul.f32 %v820_v2, %v137_v37  ;;  %v524_v55 = vmul.f32 %v839_v9, %v265_v38 }
  0x64   :  { %775 = vst [vmem:[%s2232_s3 + $0x3a0] sm:$0xff] %v647_v46  ;;  %776 = vst [vmem:[%s2232_s3 + $0x3a8] sm:$0xff] %v648_v47  ;;  %v650_v59 = vadd.f32 %v522_v48, %v392_v42  ;;  %v395_v60 = vmul.f32 %v820_v2, %v138_v43  ;;  %v525_v61 = vmul.f32 %v839_v9, %v266_v44 }
  0x65   :  { %v396_v62 = vmul.f32 %v820_v2, %v139_v45  ;;  %777 = vst [vmem:[%s2232_s3 + $0x3b0] sm:$0xff] %v649_v52  ;;  %v651_v3 = vadd.f32 %v523_v53, %v393_v49  ;;  %v652_v4 = vadd.f32 %v524_v55, %v394_v54  ;;  %v526_v5 = vmul.f32 %v839_v9, %v267_v50 }
  0x66   :  { %v397_v6 = vmul.f32 %v820_v2, %v140_v51  ;;  %778 = vst [vmem:[%s2232_s3 + $0x3b8] sm:$0xff] %v650_v59  ;;  %v653_v8 = vadd.f32 %v525_v61, %v395_v60  ;;  %v527_v10 = vmul.f32 %v839_v9, %v268_v56  ;;  %v398_v11 = vmul.f32 %v820_v2, %v141_v57 }
  0x67   :  { %v528_v12 = vmul.f32 %v839_v9, %v269_v58  ;;  %779 = vst [vmem:[%s2232_s3 + $0x3c0] sm:$0xff] %v651_v3  ;;  %780 = vst [vmem:[%s2232_s3 + $0x3c8] sm:$0xff] %v652_v4  ;;  %v654_v13 = vadd.f32 %v526_v5, %v396_v62  ;;  %v399_v14 = vmul.f32 %v820_v2, %v142_v63 }
  0x68   :  { %v529_v15 = vmul.f32 %v839_v9, %v270_v0  ;;  %v400_v16 = vmul.f32 %v820_v2, %v143_v1  ;;  %781 = vst [vmem:[%s2232_s3 + $0x3d0] sm:$0xff] %v653_v8  ;;  %v655_v17 = vadd.f32 %v527_v10, %v397_v6  ;;  %v530_v19 = vmul.f32 %v839_v9, %v271_v7 }
  0x69   :  { %v656_v18 = vadd.f32 %v528_v12, %v398_v11  ;;  %782 = vst [vmem:[%s2232_s3 + $0x3d8] sm:$0xff] %v654_v13 }
  0x6a   :  { %v657_v20 = vadd.f32 %v529_v15, %v399_v14  ;;  %783 = vst [vmem:[%s2232_s3 + $0x3e0] sm:$0xff] %v655_v17  ;;  %v658_v2 = vadd.f32 %v530_v19, %v400_v16 }
  0x6b   :  { %784 = vst [vmem:[%s2232_s3 + $0x3e8] sm:$0xff] %v656_v18 }
  0x6c   :  { %785 = vst [vmem:[%s2232_s3 + $0x3f0] sm:$0xff] %v657_v20  ;;  %786 = vst [vmem:[%s2232_s3 + $0x3f8] sm:$0xff] %v658_v2 }

</bundles_post_ra>
